<compile_context>
chip_gen: v6e
topology: v6e:2x2x1
jax: 0.10.0
libtpu: 0.0.40
codegen_flags: <defaults>
</compile_context>

<pallas_src>
import functools

import jax
import jax.numpy as jnp
from jax import lax
from jax.experimental import pallas as pl
from jax.experimental.pallas import tpu as pltpu


_VMEM_LIMIT = 32 * 1024 * 1024  # explicit scoped-VMEM budget (safe on v5e/v6e/v7x)


def _round_up(a, b):
    return ((a + b - 1) // b) * b


# ----------------------------------------------------------------------------
# Kernel 1: fused node path, tiled over rows (grid axis "parallel").
#   encoder MLP -> residual VQ -> decoder_node MLP (+ MSE partial)
#   -> decoder_edge MLP.  Per-tile loss partials go into a lane-dense (8,128)
#   block: lane 0 = feature-MSE SSE, lanes 1..num_q = per-quantizer commit SSE
#   (each value replicated across the 8 sublanes; wrapper divides by 8).
# ----------------------------------------------------------------------------
def _node_path_kernel(x_ref,
                      ew1, eb1, ew2, eb2,
                      cb_ref, cbsq_ref,
                      nw1, nb1, nw2, nb2,
                      dw1, db1, dw2, db2,
                      out_ref, qnode_ref, zedge_ref, idx_ref, loss_ref,
                      *, n_true, tile_m, num_q, need_mask):
    i = pl.program_id(0)
    x = x_ref[...]                                    # (TM, IN_DIM)
    tm = x.shape[0]

    if need_mask:
        row_ids = i * tile_m + lax.broadcasted_iota(jnp.int32, (tm, 1), 0)
        row_mask = (row_ids < n_true).astype(jnp.float32)   # (TM, 1)
    else:
        row_mask = None

    # ---- encoder MLP ----
    h = jnp.maximum(
        jnp.dot(x, ew1[...], preferred_element_type=jnp.float32) + eb1[...], 0.0)
    out = jnp.dot(h, ew2[...], preferred_element_type=jnp.float32) + eb2[...]
    out_ref[...] = out

    # ---- residual vector quantization ----
    c = cb_ref.shape[1]
    residual = out
    quantized = jnp.zeros_like(out)
    iota_c = lax.broadcasted_iota(jnp.int32, (tm, c), 1)
    idx_cols = []
    commit_sums = []
    for q in range(num_q):
        cb = cb_ref[q]                                # (C, D)
        c2 = cbsq_ref[q]                              # (1, C) precomputed ||cb||^2
        xc = lax.dot_general(residual, cb, (((1,), (1,)), ((), ())),
                             preferred_element_type=jnp.float32)      # (TM, C)
        # argmin over ||r - cb||^2  ==  argmin over (||cb||^2 - 2 r.cb)
        scores = c2 - 2.0 * xc
        min_s = jnp.min(scores, axis=-1, keepdims=True)
        idx = jnp.min(jnp.where(scores <= min_s, iota_c, c),
                      axis=-1, keepdims=True)                          # (TM, 1)
        onehot = (iota_c == idx).astype(jnp.float32)
        qq = jnp.dot(onehot, cb, preferred_element_type=jnp.float32)   # (TM, D)

        diff = qq - residual
        if need_mask:
            diff = diff * row_mask
        commit_sums.append(jnp.sum(diff * diff))       # scalar SSE (unnormalized)
        idx_cols.append(idx)
        quantized = quantized + qq
        residual = residual - qq
    idx_ref[...] = jnp.concatenate(idx_cols, axis=-1)

    # ---- decoder_node MLP + masked MSE partial ----
    hn = jnp.maximum(
        jnp.dot(quantized, nw1[...], preferred_element_type=jnp.float32) + nb1[...], 0.0)
    qnode = jnp.dot(hn, nw2[...], preferred_element_type=jnp.float32) + nb2[...]
    qnode_ref[...] = qnode
    dm = qnode - x
    if need_mask:
        dm = dm * row_mask
    mse_sum = jnp.sum(dm * dm)

    # ---- decoder_edge MLP (emit Z tile for the edge kernel) ----
    he = jnp.maximum(
        jnp.dot(quantized, dw1[...], preferred_element_type=jnp.float32) + db1[...], 0.0)
    zedge_ref[...] = jnp.dot(he, dw2[...], preferred_element_type=jnp.float32) + db2[...]

    # ---- per-tile loss partial (no resident accumulator -> "parallel" grid) ----
    lane = lax.broadcasted_iota(jnp.int32, (8, 128), 1)
    part = jnp.where(lane == 0, mse_sum, 0.0)
    for q in range(num_q):
        part = part + jnp.where(lane == q + 1, commit_sums[q], 0.0)
    loss_ref[...] = part


# ----------------------------------------------------------------------------
# Kernel 2: tiled softplus-sum over Z @ Z.T (never materializes the NxN matrix).
#   Triangular (j >= i) block list supplied via scalar prefetch; off-diagonal
#   blocks weighted by 2 (symmetry).  Boundary masking gated behind pl.when
#   with rank-1 float masks.  bf16 matmul inputs, f32 accumulate / softplus.
# ----------------------------------------------------------------------------
def _edge_softplus_kernel(bi_ref, bj_ref, zr_ref, zc_ref, out_ref,
                          *, n_true, tile, boundary_block, need_mask):
    t = pl.program_id(0)
    bi = bi_ref[t]
    bj = bj_ref[t]

    zr = zr_ref[...].astype(jnp.bfloat16)             # (T, F)
    zc = zc_ref[...].astype(jnp.bfloat16)             # (T, F)
    logits = lax.dot_general(zr, zc, (((1,), (1,)), ((), ())),
                             preferred_element_type=jnp.float32)       # (T, T)
    # numerically stable softplus (kept f32: correct on v5e as well)
    sp = jnp.maximum(logits, 0.0) + jnp.log(1.0 + jnp.exp(-jnp.abs(logits)))
    weight = jnp.where(bi == bj, 1.0, 2.0)

    if need_mask:
        is_boundary = jnp.logical_or(bi == boundary_block, bj == boundary_block)

        @pl.when(is_boundary)
        def _():
            rows = bi * tile + lax.broadcasted_iota(jnp.int32, (tile, 1), 0)
            cols = bj * tile + lax.broadcasted_iota(jnp.int32, (1, tile), 1)
            rmask = (rows < n_true).astype(jnp.float32)     # (T, 1)
            cmask = (cols < n_true).astype(jnp.float32)     # (1, T)
            s = jnp.sum((sp * cmask) * rmask)
            out_ref[...] = jnp.full((8, 128), weight * s, jnp.float32)

        @pl.when(jnp.logical_not(is_boundary))
        def _():
            out_ref[...] = jnp.full((8, 128), weight * jnp.sum(sp), jnp.float32)
    else:
        out_ref[...] = jnp.full((8, 128), weight * jnp.sum(sp), jnp.float32)


def _edge_softplus_sum(z_pad, tile, n_true):
    n_pad, f = z_pad.shape
    # only blocks that contain at least one real row/col
    nb_eff = -(-n_true // tile)                        # ceil(n_true / tile)
    need_mask = (n_true % tile) != 0

    tri_i, tri_j = [], []
    for i in range(nb_eff):
        for j in range(i, nb_eff):
            tri_i.append(i)
            tri_j.append(j)
    num_steps = len(tri_i)
    bi_host = jnp.asarray(tri_i, jnp.int32)
    bj_host = jnp.asarray(tri_j, jnp.int32)

    kern = functools.partial(_edge_softplus_kernel, n_true=n_true, tile=tile,
                             boundary_block=nb_eff - 1, need_mask=need_mask)
    partials = pl.pallas_call(
        kern,
        out_shape=jax.ShapeDtypeStruct((num_steps * 8, 128), jnp.float32),
        grid_spec=pltpu.PrefetchScalarGridSpec(
            num_scalar_prefetch=2,
            grid=(num_steps,),
            in_specs=[pl.BlockSpec((tile, f), lambda t, bi_r, bj_r: (bi_r[t], 0)),
                      pl.BlockSpec((tile, f), lambda t, bi_r, bj_r: (bj_r[t], 0))],
            out_specs=pl.BlockSpec((8, 128), lambda t, bi_r, bj_r: (t, 0))),
        compiler_params=pltpu.CompilerParams(
            dimension_semantics=("parallel",),
            vmem_limit_bytes=_VMEM_LIMIT),
    )(bi_host, bj_host, z_pad, z_pad)
    return jnp.sum(partials) / 1024.0


# ----------------------------------------------------------------------------
# Parameter init (deterministic, synthetic) + full forward wrapper
# ----------------------------------------------------------------------------
def _init_linear(key, d_in, d_out):
    k1, k2 = jax.random.split(key)
    scale = 1.0 / jnp.sqrt(jnp.float32(d_in))
    w = jax.random.uniform(k1, (d_in, d_out), jnp.float32, -scale, scale)
    b = jax.random.uniform(k2, (1, d_out), jnp.float32, -scale, scale)
    return w, b


def init_params(key, in_dim, hidden, codebook_dim, num_codebook, codebook_size):
    keys = jax.random.split(key, 7)
    enc = _init_linear(keys[0], in_dim, hidden) + _init_linear(keys[1], hidden, codebook_dim)
    dec_node = _init_linear(keys[2], codebook_dim, hidden) + _init_linear(keys[3], hidden, in_dim)
    dec_edge = _init_linear(keys[4], codebook_dim, hidden) + _init_linear(keys[5], hidden, in_dim)
    # TODO(synk): kmeans_init / EMA codebook updates are stateful training-time ops;
    # codebooks are initialized deterministically here instead.
    codebooks = jax.random.normal(keys[6], (num_codebook, codebook_size, codebook_dim),
                                  jnp.float32)
    return dict(encoder=enc, decoder_node=dec_node, decoder_edge=dec_edge,
                codebooks=codebooks)


def rqvae_forward(x, edge_index, params,
                  edge_rec_loss_weight=1.0, feature_rec_loss_weight=1.0,
                  commitment_weight=1.0, node_tile=2048, edge_tile=1024):
    """Mirrors RQVAE.forward for the config documented at the top of this file.

    Returns (out, quantized_node, indices, loss, commit_loss,
             feature_rec_loss, edge_rec_loss, cluster_loss)."""
    n, in_dim = x.shape
    codebooks = params["codebooks"]
    num_q, csize, cdim = codebooks.shape
    assert num_q + 1 <= 128

    # node tile is large (per-row work is tiny); edge tile kept separate but
    # chosen so that one zero-padding serves both kernels.
    node_tile = min(node_tile, _round_up(n, 8))
    edge_tile = min(edge_tile, node_tile)
    if node_tile % edge_tile != 0:
        edge_tile = node_tile
    n_pad = _round_up(n, node_tile)
    x_pad = x if n_pad == n else jnp.pad(x, ((0, n_pad - n), (0, 0)))
    need_node_mask = (n_pad != n)

    # precompute ||codebook||^2 per quantizer: (num_q, 1, C)
    cbsq = jnp.sum(codebooks * codebooks, axis=-1)[:, None, :]

    (ew1, eb1, ew2, eb2) = params["encoder"]
    (nw1, nb1, nw2, nb2) = params["decoder_node"]
    (dw1, db1, dw2, db2) = params["decoder_edge"]

    def _full(a):
        return pl.BlockSpec(a.shape, lambda *_, _nd=a.ndim: (0,) * _nd)

    n_blocks = n_pad // node_tile
    kern = functools.partial(_node_path_kernel, n_true=n, tile_m=node_tile,
                             num_q=num_q, need_mask=need_node_mask)
    in_specs = [pl.BlockSpec((node_tile, in_dim), lambda i: (i, 0))] + [
        _full(a) for a in (ew1, eb1, ew2, eb2, codebooks, cbsq,
                           nw1, nb1, nw2, nb2, dw1, db1, dw2, db2)]
    out_specs = (
        pl.BlockSpec((node_tile, cdim), lambda i: (i, 0)),
        pl.BlockSpec((node_tile, in_dim), lambda i: (i, 0)),
        pl.BlockSpec((node_tile, in_dim), lambda i: (i, 0)),
        pl.BlockSpec((node_tile, num_q), lambda i: (i, 0)),
        pl.BlockSpec((8, 128), lambda i: (i, 0)),
    )
    out_shape = (
        jax.ShapeDtypeStruct((n_pad, cdim), jnp.float32),       # encoder output
        jax.ShapeDtypeStruct((n_pad, in_dim), jnp.float32),     # quantized_node
        jax.ShapeDtypeStruct((n_pad, in_dim), jnp.float32),     # quantized_edge (Z)
        jax.ShapeDtypeStruct((n_pad, num_q), jnp.int32),        # indices
        jax.ShapeDtypeStruct((n_blocks * 8, 128), jnp.float32), # per-tile loss partials
    )
    out_pad, qnode_pad, zedge_pad, idx_pad, loss_parts = pl.pallas_call(
        kern,
        out_shape=out_shape,
        grid=(n_blocks,),
        in_specs=in_specs,
        out_specs=out_specs,
        compiler_params=pltpu.CompilerParams(
            dimension_semantics=("parallel",),
            vmem_limit_bytes=_VMEM_LIMIT),
    )(x_pad, ew1, eb1, ew2, eb2, codebooks, cbsq,
      nw1, nb1, nw2, nb2, dw1, db1, dw2, db2)

    # each partial value is replicated across 8 sublanes -> divide by 8
    col_sums = jnp.sum(loss_parts, axis=0) / 8.0
    feature_rec_loss = col_sums[0] / float(n * in_dim)
    commit_loss = commitment_weight * jnp.sum(col_sums[1:1 + num_q]) / float(n * cdim)

    # edge reconstruction: mean BCE-with-logits over the dense adjacency,
    # computed as softplus-sum over all pairs minus the per-edge logit sum
    # (matches torch sparse->dense which sums duplicate edges).
    softplus_sum = _edge_softplus_sum(zedge_pad, edge_tile, n)
    z_e = zedge_pad[:n]
    corr = jnp.sum(z_e[edge_index[0]] * z_e[edge_index[1]])
    edge_rec_loss = (softplus_sum - corr) / float(n * n)

    loss = (commit_loss
            + edge_rec_loss_weight * edge_rec_loss
            + feature_rec_loss_weight * feature_rec_loss)
    cluster_loss = jnp.float32(0.0)  # cluster_loss=False (DMoNPooling disabled)

    return (out_pad[:n], qnode_pad[:n], idx_pad[:n], loss, commit_loss,
            feature_rec_loss, edge_rec_loss, cluster_loss)


if __name__ == "__main__":
    N, IN_DIM, HIDDEN = 8, 16, 32
    CODEBOOK_DIM, NUM_CODEBOOK, CODEBOOK_SIZE = 8, 2, 16
    NUM_EDGES = 16

    key = jax.random.PRNGKey(0)
    kx, ks, kd, kp = jax.random.split(key, 4)

    x = jax.random.normal(kx, (N, IN_DIM), jnp.float32)           # batch.x
    src = jax.random.randint(ks, (NUM_EDGES,), 0, N, jnp.int32)
    dst = jax.random.randint(kd, (NUM_EDGES,), 0, N, jnp.int32)
    edge_index = jnp.stack([src, dst], axis=0)                    # batch.edge_index

    params = init_params(kp, IN_DIM, HIDDEN, CODEBOOK_DIM, NUM_CODEBOOK, CODEBOOK_SIZE)

    outs = rqvae_forward(x, edge_index, params)
    outs = jax.block_until_ready(outs)

    out, quantized_node, indices, loss, commit_loss, feat_l, edge_l, clus_l = outs
    assert out.shape == (N, CODEBOOK_DIM)
    assert quantized_node.shape == (N, IN_DIM)
    assert indices.shape == (N, NUM_CODEBOOK)
    assert loss.shape == () and bool(jnp.isfinite(loss))
    assert bool(jnp.isfinite(feat_l)) and bool(jnp.isfinite(edge_l))
    print("KERNEL_OK")
</pallas_src>

<mosaic_0001>
module attributes {stable_mosaic.version = 11 : i64} {
  func.func @_node_path_kernel(%arg0: i32, %arg1: memref<8x16xf32, #tpu.memory_space<vmem>>, %arg2: memref<16x32xf32, #tpu.memory_space<vmem>>, %arg3: memref<1x32xf32, #tpu.memory_space<vmem>>, %arg4: memref<32x8xf32, #tpu.memory_space<vmem>>, %arg5: memref<1x8xf32, #tpu.memory_space<vmem>>, %arg6: memref<2x16x8xf32, #tpu.memory_space<vmem>>, %arg7: memref<2x1x16xf32, #tpu.memory_space<vmem>>, %arg8: memref<8x32xf32, #tpu.memory_space<vmem>>, %arg9: memref<1x32xf32, #tpu.memory_space<vmem>>, %arg10: memref<32x16xf32, #tpu.memory_space<vmem>>, %arg11: memref<1x16xf32, #tpu.memory_space<vmem>>, %arg12: memref<8x32xf32, #tpu.memory_space<vmem>>, %arg13: memref<1x32xf32, #tpu.memory_space<vmem>>, %arg14: memref<32x16xf32, #tpu.memory_space<vmem>>, %arg15: memref<1x16xf32, #tpu.memory_space<vmem>>, %arg16: memref<8x8xf32, #tpu.memory_space<vmem>>, %arg17: memref<8x16xf32, #tpu.memory_space<vmem>>, %arg18: memref<8x16xf32, #tpu.memory_space<vmem>>, %arg19: memref<8x2xi32, #tpu.memory_space<vmem>>, %arg20: memref<8x128xf32, #tpu.memory_space<vmem>>) attributes {dimension_semantics = [#tpu.dimension_semantics<parallel>], iteration_bounds = array<i64: 1>, scalar_prefetch = 0 : i64, scratch_operands = 0 : i64, tpu.core_type = #tpu.core_type<tc>, window_params = [{transform_indices = @transform_0, window_bounds = array<i64: 8, 16>}, {pipeline_mode = #tpu.pipeline_mode<synchronous>, transform_indices = @transform_1, window_bounds = array<i64: 16, 32>}, {pipeline_mode = #tpu.pipeline_mode<synchronous>, transform_indices = @transform_2, window_bounds = array<i64: 1, 32>}, {pipeline_mode = #tpu.pipeline_mode<synchronous>, transform_indices = @transform_3, window_bounds = array<i64: 32, 8>}, {pipeline_mode = #tpu.pipeline_mode<synchronous>, transform_indices = @transform_4, window_bounds = array<i64: 1, 8>}, {pipeline_mode = #tpu.pipeline_mode<synchronous>, transform_indices = @transform_5, window_bounds = array<i64: 2, 16, 8>}, {pipeline_mode = #tpu.pipeline_mode<synchronous>, transform_indices = @transform_6, window_bounds = array<i64: 2, 1, 16>}, {pipeline_mode = #tpu.pipeline_mode<synchronous>, transform_indices = @transform_7, window_bounds = array<i64: 8, 32>}, {pipeline_mode = #tpu.pipeline_mode<synchronous>, transform_indices = @transform_8, window_bounds = array<i64: 1, 32>}, {pipeline_mode = #tpu.pipeline_mode<synchronous>, transform_indices = @transform_9, window_bounds = array<i64: 32, 16>}, {pipeline_mode = #tpu.pipeline_mode<synchronous>, transform_indices = @transform_10, window_bounds = array<i64: 1, 16>}, {pipeline_mode = #tpu.pipeline_mode<synchronous>, transform_indices = @transform_11, window_bounds = array<i64: 8, 32>}, {pipeline_mode = #tpu.pipeline_mode<synchronous>, transform_indices = @transform_12, window_bounds = array<i64: 1, 32>}, {pipeline_mode = #tpu.pipeline_mode<synchronous>, transform_indices = @transform_13, window_bounds = array<i64: 32, 16>}, {pipeline_mode = #tpu.pipeline_mode<synchronous>, transform_indices = @transform_14, window_bounds = array<i64: 1, 16>}, {transform_indices = @transform_15, window_bounds = array<i64: 8, 8>}, {transform_indices = @transform_16, window_bounds = array<i64: 8, 16>}, {transform_indices = @transform_17, window_bounds = array<i64: 8, 16>}, {transform_indices = @transform_18, window_bounds = array<i64: 8, 2>}, {transform_indices = @transform_19, window_bounds = array<i64: 8, 128>}]} {
    %c0 = arith.constant 0 : index
    %c0_0 = arith.constant 0 : index
    %0 = vector.load %arg1[%c0, %c0_0] : memref<8x16xf32, #tpu.memory_space<vmem>>, vector<8x16xf32>
    %c0_1 = arith.constant 0 : index
    %c0_2 = arith.constant 0 : index
    %1 = vector.load %arg2[%c0_1, %c0_2] : memref<16x32xf32, #tpu.memory_space<vmem>>, vector<16x32xf32>
    %cst = arith.constant dense<0.000000e+00> : vector<8x32xf32>
    %2 = tpu.matmul %0, %1, %cst {dimension_numbers = #tpu.dot_dimension_numbers<[1], [0], [0], [1], [0, 0, 1, 1], [], []>} : vector<8x16xf32>, vector<16x32xf32>, vector<8x32xf32> -> vector<8x32xf32>
    %c0_3 = arith.constant 0 : index
    %c0_4 = arith.constant 0 : index
    %3 = vector.load %arg3[%c0_3, %c0_4] : memref<1x32xf32, #tpu.memory_space<vmem>>, vector<1x32xf32>
    %4 = vector.broadcast %3 : vector<1x32xf32> to vector<8x32xf32>
    %5 = arith.addf %2, %4 : vector<8x32xf32>
    %cst_5 = arith.constant 0.000000e+00 : f32
    %6 = vector.broadcast %cst_5 : f32 to vector<8x32xf32>
    %7 = arith.maximumf %5, %6 : vector<8x32xf32>
    %c0_6 = arith.constant 0 : index
    %c0_7 = arith.constant 0 : index
    %8 = vector.load %arg4[%c0_6, %c0_7] : memref<32x8xf32, #tpu.memory_space<vmem>>, vector<32x8xf32>
    %cst_8 = arith.constant dense<0.000000e+00> : vector<8x8xf32>
    %9 = tpu.matmul %7, %8, %cst_8 {dimension_numbers = #tpu.dot_dimension_numbers<[1], [0], [0], [1], [0, 0, 1, 1], [], []>} : vector<8x32xf32>, vector<32x8xf32>, vector<8x8xf32> -> vector<8x8xf32>
    %c0_9 = arith.constant 0 : index
    %c0_10 = arith.constant 0 : index
    %10 = vector.load %arg5[%c0_9, %c0_10] : memref<1x8xf32, #tpu.memory_space<vmem>>, vector<1x8xf32>
    %11 = vector.broadcast %10 : vector<1x8xf32> to vector<8x8xf32>
    %12 = arith.addf %9, %11 : vector<8x8xf32>
    %c0_11 = arith.constant 0 : index
    %c0_12 = arith.constant 0 : index
    %13 = vector.load %arg16[%c0_11, %c0_12] : memref<8x8xf32, #tpu.memory_space<vmem>>, vector<8x8xf32>
    tpu.vector_store %arg16[%c0_11, %c0_12], %12 {strides = array<i32>} : memref<8x8xf32, #tpu.memory_space<vmem>>, vector<8x8xf32>,
    %cst_13 = arith.constant 0.000000e+00 : f32
    %14 = vector.broadcast %cst_13 : f32 to vector<8x8xf32>
    %15 = tpu.iota {dimensions = array<i32: 1>} : vector<8x16xi32>
    %c0_14 = arith.constant 0 : index
    %c0_15 = arith.constant 0 : index
    %c0_16 = arith.constant 0 : index
    %16 = vector.load %arg6[%c0_14, %c0_15, %c0_16] : memref<2x16x8xf32, #tpu.memory_space<vmem>>, vector<1x16x8xf32>
    %17 = vector.shape_cast %16 : vector<1x16x8xf32> to vector<16x8xf32>
    %c0_17 = arith.constant 0 : index
    %c0_18 = arith.constant 0 : index
    %c0_19 = arith.constant 0 : index
    %18 = vector.load %arg7[%c0_17, %c0_18, %c0_19] : memref<2x1x16xf32, #tpu.memory_space<vmem>>, vector<1x1x16xf32>
    %19 = vector.shape_cast %18 : vector<1x1x16xf32> to vector<1x16xf32>
    %cst_20 = arith.constant dense<0.000000e+00> : vector<8x16xf32>
    %20 = tpu.matmul %12, %17, %cst_20 {dimension_numbers = #tpu.dot_dimension_numbers<[1], [1], [0], [0], [0, 0, 1, 0], [], []>} : vector<8x8xf32>, vector<16x8xf32>, vector<8x16xf32> -> vector<8x16xf32>
    %cst_21 = arith.constant 2.000000e+00 : f32
    %21 = vector.broadcast %cst_21 : f32 to vector<8x16xf32>
    %22 = arith.mulf %21, %20 : vector<8x16xf32>
    %23 = vector.broadcast %19 : vector<1x16xf32> to vector<8x16xf32>
    %24 = arith.subf %23, %22 : vector<8x16xf32>
    %cst_22 = arith.constant dense<0x7F800000> : vector<8xf32>
    %25 = vector.multi_reduction <minimumf>, %24, %cst_22 [1] : vector<8x16xf32> to vector<8xf32>
    %26 = vector.shape_cast %25 : vector<8xf32> to vector<8x1xf32>
    %27 = vector.broadcast %26 : vector<8x1xf32> to vector<8x16xf32>
    %28 = arith.cmpf ole, %24, %27 : vector<8x16xf32>
    %c16_i32 = arith.constant 16 : i32
    %29 = vector.broadcast %c16_i32 : i32 to vector<8x16xi32>
    %30 = arith.select %28, %15, %29 : vector<8x16xi1>, vector<8x16xi32>
    %cst_23 = arith.constant dense<2147483647> : vector<8xi32>
    %31 = vector.multi_reduction <minsi>, %30, %cst_23 [1] : vector<8x16xi32> to vector<8xi32>
    %32 = vector.shape_cast %31 : vector<8xi32> to vector<8x1xi32>
    %33 = vector.broadcast %32 : vector<8x1xi32> to vector<8x16xi32>
    %34 = arith.cmpi eq, %15, %33 : vector<8x16xi32>
    %35 = arith.extui %34 : vector<8x16xi1> to vector<8x16xi32>
    %36 = arith.sitofp %35 : vector<8x16xi32> to vector<8x16xf32>
    %cst_24 = arith.constant dense<0.000000e+00> : vector<8x8xf32>
    %37 = tpu.matmul %36, %17, %cst_24 {dimension_numbers = #tpu.dot_dimension_numbers<[1], [0], [0], [1], [0, 0, 1, 1], [], []>} : vector<8x16xf32>, vector<16x8xf32>, vector<8x8xf32> -> vector<8x8xf32>
    %38 = arith.subf %37, %12 : vector<8x8xf32>
    %39 = arith.mulf %38, %38 : vector<8x8xf32>
    %40 = vector.shape_cast %39 : vector<8x8xf32> to vector<1x8x8xf32>
    %cst_25 = arith.constant dense<0.000000e+00> : vector<1xf32>
    %41 = vector.multi_reduction <add>, %40, %cst_25 [1, 2] : vector<1x8x8xf32> to vector<1xf32>
    %42 = vector.shape_cast %41 : vector<1xf32> to vector<1x1x1xf32>
    %43 = vector.extract %42[0, 0, 0] : f32 from vector<1x1x1xf32>
    %44 = arith.addf %14, %37 : vector<8x8xf32>
    %45 = arith.subf %12, %37 : vector<8x8xf32>
    %c1 = arith.constant 1 : index
    %c0_26 = arith.constant 0 : index
    %c0_27 = arith.constant 0 : index
    %46 = vector.load %arg6[%c1, %c0_26, %c0_27] : memref<2x16x8xf32, #tpu.memory_space<vmem>>, vector<1x16x8xf32>
    %47 = vector.shape_cast %46 : vector<1x16x8xf32> to vector<16x8xf32>
    %c1_28 = arith.constant 1 : index
    %c0_29 = arith.constant 0 : index
    %c0_30 = arith.constant 0 : index
    %48 = vector.load %arg7[%c1_28, %c0_29, %c0_30] : memref<2x1x16xf32, #tpu.memory_space<vmem>>, vector<1x1x16xf32>
    %49 = vector.shape_cast %48 : vector<1x1x16xf32> to vector<1x16xf32>
    %cst_31 = arith.constant dense<0.000000e+00> : vector<8x16xf32>
    %50 = tpu.matmul %45, %47, %cst_31 {dimension_numbers = #tpu.dot_dimension_numbers<[1], [1], [0], [0], [0, 0, 1, 0], [], []>} : vector<8x8xf32>, vector<16x8xf32>, vector<8x16xf32> -> vector<8x16xf32>
    %cst_32 = arith.constant 2.000000e+00 : f32
    %51 = vector.broadcast %cst_32 : f32 to vector<8x16xf32>
    %52 = arith.mulf %51, %50 : vector<8x16xf32>
    %53 = vector.broadcast %49 : vector<1x16xf32> to vector<8x16xf32>
    %54 = arith.subf %53, %52 : vector<8x16xf32>
    %cst_33 = arith.constant dense<0x7F800000> : vector<8xf32>
    %55 = vector.multi_reduction <minimumf>, %54, %cst_33 [1] : vector<8x16xf32> to vector<8xf32>
    %56 = vector.shape_cast %55 : vector<8xf32> to vector<8x1xf32>
    %57 = vector.broadcast %56 : vector<8x1xf32> to vector<8x16xf32>
    %58 = arith.cmpf ole, %54, %57 : vector<8x16xf32>
    %c16_i32_34 = arith.constant 16 : i32
    %59 = vector.broadcast %c16_i32_34 : i32 to vector<8x16xi32>
    %60 = arith.select %58, %15, %59 : vector<8x16xi1>, vector<8x16xi32>
    %cst_35 = arith.constant dense<2147483647> : vector<8xi32>
    %61 = vector.multi_reduction <minsi>, %60, %cst_35 [1] : vector<8x16xi32> to vector<8xi32>
    %62 = vector.shape_cast %61 : vector<8xi32> to vector<8x1xi32>
    %63 = vector.broadcast %62 : vector<8x1xi32> to vector<8x16xi32>
    %64 = arith.cmpi eq, %15, %63 : vector<8x16xi32>
    %65 = arith.extui %64 : vector<8x16xi1> to vector<8x16xi32>
    %66 = arith.sitofp %65 : vector<8x16xi32> to vector<8x16xf32>
    %cst_36 = arith.constant dense<0.000000e+00> : vector<8x8xf32>
    %67 = tpu.matmul %66, %47, %cst_36 {dimension_numbers = #tpu.dot_dimension_numbers<[1], [0], [0], [1], [0, 0, 1, 1], [], []>} : vector<8x16xf32>, vector<16x8xf32>, vector<8x8xf32> -> vector<8x8xf32>
    %68 = arith.subf %67, %45 : vector<8x8xf32>
    %69 = arith.mulf %68, %68 : vector<8x8xf32>
    %70 = vector.shape_cast %69 : vector<8x8xf32> to vector<1x8x8xf32>
    %cst_37 = arith.constant dense<0.000000e+00> : vector<1xf32>
    %71 = vector.multi_reduction <add>, %70, %cst_37 [1, 2] : vector<1x8x8xf32> to vector<1xf32>
    %72 = vector.shape_cast %71 : vector<1xf32> to vector<1x1x1xf32>
    %73 = vector.extract %72[0, 0, 0] : f32 from vector<1x1x1xf32>
    %74 = arith.addf %44, %67 : vector<8x8xf32>
    %75 = tpu.concatenate %32, %62 in 1 : vector<8x1xi32>, vector<8x1xi32> -> vector<8x2xi32>
    %c0_38 = arith.constant 0 : index
    %c0_39 = arith.constant 0 : index
    %76 = vector.load %arg19[%c0_38, %c0_39] : memref<8x2xi32, #tpu.memory_space<vmem>>, vector<8x2xi32>
    tpu.vector_store %arg19[%c0_38, %c0_39], %75 {strides = array<i32>} : memref<8x2xi32, #tpu.memory_space<vmem>>, vector<8x2xi32>,
    %c0_40 = arith.constant 0 : index
    %c0_41 = arith.constant 0 : index
    %77 = vector.load %arg8[%c0_40, %c0_41] : memref<8x32xf32, #tpu.memory_space<vmem>>, vector<8x32xf32>
    %cst_42 = arith.constant dense<0.000000e+00> : vector<8x32xf32>
    %78 = tpu.matmul %74, %77, %cst_42 {dimension_numbers = #tpu.dot_dimension_numbers<[1], [0], [0], [1], [0, 0, 1, 1], [], []>} : vector<8x8xf32>, vector<8x32xf32>, vector<8x32xf32> -> vector<8x32xf32>
    %c0_43 = arith.constant 0 : index
    %c0_44 = arith.constant 0 : index
    %79 = vector.load %arg9[%c0_43, %c0_44] : memref<1x32xf32, #tpu.memory_space<vmem>>, vector<1x32xf32>
    %80 = vector.broadcast %79 : vector<1x32xf32> to vector<8x32xf32>
    %81 = arith.addf %78, %80 : vector<8x32xf32>
    %cst_45 = arith.constant 0.000000e+00 : f32
    %82 = vector.broadcast %cst_45 : f32 to vector<8x32xf32>
    %83 = arith.maximumf %81, %82 : vector<8x32xf32>
    %c0_46 = arith.constant 0 : index
    %c0_47 = arith.constant 0 : index
    %84 = vector.load %arg10[%c0_46, %c0_47] : memref<32x16xf32, #tpu.memory_space<vmem>>, vector<32x16xf32>
    %cst_48 = arith.constant dense<0.000000e+00> : vector<8x16xf32>
    %85 = tpu.matmul %83, %84, %cst_48 {dimension_numbers = #tpu.dot_dimension_numbers<[1], [0], [0], [1], [0, 0, 1, 1], [], []>} : vector<8x32xf32>, vector<32x16xf32>, vector<8x16xf32> -> vector<8x16xf32>
    %c0_49 = arith.constant 0 : index
    %c0_50 = arith.constant 0 : index
    %86 = vector.load %arg11[%c0_49, %c0_50] : memref<1x16xf32, #tpu.memory_space<vmem>>, vector<1x16xf32>
    %87 = vector.broadcast %86 : vector<1x16xf32> to vector<8x16xf32>
    %88 = arith.addf %85, %87 : vector<8x16xf32>
    %c0_51 = arith.constant 0 : index
    %c0_52 = arith.constant 0 : index
    %89 = vector.load %arg17[%c0_51, %c0_52] : memref<8x16xf32, #tpu.memory_space<vmem>>, vector<8x16xf32>
    tpu.vector_store %arg17[%c0_51, %c0_52], %88 {strides = array<i32>} : memref<8x16xf32, #tpu.memory_space<vmem>>, vector<8x16xf32>,
    %90 = arith.subf %88, %0 : vector<8x16xf32>
    %91 = arith.mulf %90, %90 : vector<8x16xf32>
    %92 = vector.shape_cast %91 : vector<8x16xf32> to vector<1x8x16xf32>
    %cst_53 = arith.constant dense<0.000000e+00> : vector<1xf32>
    %93 = vector.multi_reduction <add>, %92, %cst_53 [1, 2] : vector<1x8x16xf32> to vector<1xf32>
    %94 = vector.shape_cast %93 : vector<1xf32> to vector<1x1x1xf32>
    %95 = vector.extract %94[0, 0, 0] : f32 from vector<1x1x1xf32>
    %c0_54 = arith.constant 0 : index
    %c0_55 = arith.constant 0 : index
    %96 = vector.load %arg12[%c0_54, %c0_55] : memref<8x32xf32, #tpu.memory_space<vmem>>, vector<8x32xf32>
    %cst_56 = arith.constant dense<0.000000e+00> : vector<8x32xf32>
    %97 = tpu.matmul %74, %96, %cst_56 {dimension_numbers = #tpu.dot_dimension_numbers<[1], [0], [0], [1], [0, 0, 1, 1], [], []>} : vector<8x8xf32>, vector<8x32xf32>, vector<8x32xf32> -> vector<8x32xf32>
    %c0_57 = arith.constant 0 : index
    %c0_58 = arith.constant 0 : index
    %98 = vector.load %arg13[%c0_57, %c0_58] : memref<1x32xf32, #tpu.memory_space<vmem>>, vector<1x32xf32>
    %99 = vector.broadcast %98 : vector<1x32xf32> to vector<8x32xf32>
    %100 = arith.addf %97, %99 : vector<8x32xf32>
    %cst_59 = arith.constant 0.000000e+00 : f32
    %101 = vector.broadcast %cst_59 : f32 to vector<8x32xf32>
    %102 = arith.maximumf %100, %101 : vector<8x32xf32>
    %c0_60 = arith.constant 0 : index
    %c0_61 = arith.constant 0 : index
    %103 = vector.load %arg14[%c0_60, %c0_61] : memref<32x16xf32, #tpu.memory_space<vmem>>, vector<32x16xf32>
    %cst_62 = arith.constant dense<0.000000e+00> : vector<8x16xf32>
    %104 = tpu.matmul %102, %103, %cst_62 {dimension_numbers = #tpu.dot_dimension_numbers<[1], [0], [0], [1], [0, 0, 1, 1], [], []>} : vector<8x32xf32>, vector<32x16xf32>, vector<8x16xf32> -> vector<8x16xf32>
    %c0_63 = arith.constant 0 : index
    %c0_64 = arith.constant 0 : index
    %105 = vector.load %arg15[%c0_63, %c0_64] : memref<1x16xf32, #tpu.memory_space<vmem>>, vector<1x16xf32>
    %106 = vector.broadcast %105 : vector<1x16xf32> to vector<8x16xf32>
    %107 = arith.addf %104, %106 : vector<8x16xf32>
    %c0_65 = arith.constant 0 : index
    %c0_66 = arith.constant 0 : index
    %108 = vector.load %arg18[%c0_65, %c0_66] : memref<8x16xf32, #tpu.memory_space<vmem>>, vector<8x16xf32>
    tpu.vector_store %arg18[%c0_65, %c0_66], %107 {strides = array<i32>} : memref<8x16xf32, #tpu.memory_space<vmem>>, vector<8x16xf32>,
    %109 = tpu.iota {dimensions = array<i32: 1>} : vector<8x128xi32>
    %c0_i32 = arith.constant 0 : i32
    %110 = vector.broadcast %c0_i32 : i32 to vector<8x128xi32>
    %111 = arith.cmpi eq, %109, %110 : vector<8x128xi32>
    %cst_67 = arith.constant 0.000000e+00 : f32
    %112 = vector.broadcast %95 : f32 to vector<8x128xf32>
    %113 = vector.broadcast %cst_67 : f32 to vector<8x128xf32>
    %114 = arith.select %111, %112, %113 : vector<8x128xi1>, vector<8x128xf32>
    %c1_i32 = arith.constant 1 : i32
    %115 = vector.broadcast %c1_i32 : i32 to vector<8x128xi32>
    %116 = arith.cmpi eq, %109, %115 : vector<8x128xi32>
    %cst_68 = arith.constant 0.000000e+00 : f32
    %117 = vector.broadcast %43 : f32 to vector<8x128xf32>
    %118 = vector.broadcast %cst_68 : f32 to vector<8x128xf32>
    %119 = arith.select %116, %117, %118 : vector<8x128xi1>, vector<8x128xf32>
    %120 = arith.addf %114, %119 : vector<8x128xf32>
    %c2_i32 = arith.constant 2 : i32
    %121 = vector.broadcast %c2_i32 : i32 to vector<8x128xi32>
    %122 = arith.cmpi eq, %109, %121 : vector<8x128xi32>
    %cst_69 = arith.constant 0.000000e+00 : f32
    %123 = vector.broadcast %73 : f32 to vector<8x128xf32>
    %124 = vector.broadcast %cst_69 : f32 to vector<8x128xf32>
    %125 = arith.select %122, %123, %124 : vector<8x128xi1>, vector<8x128xf32>
    %126 = arith.addf %120, %125 : vector<8x128xf32>
    %c0_70 = arith.constant 0 : index
    %c0_71 = arith.constant 0 : index
    %127 = vector.load %arg20[%c0_70, %c0_71] : memref<8x128xf32, #tpu.memory_space<vmem>>, vector<8x128xf32>
    tpu.vector_store %arg20[%c0_70, %c0_71], %126 {strides = array<i32>} : memref<8x128xf32, #tpu.memory_space<vmem>>, vector<8x128xf32>,
    return
  }
  func.func @transform_0(%arg0: i32) -> (i32, i32) {
    %c0_i32 = arith.constant 0 : i32
    %c0_i32_0 = arith.constant 0 : i32
    return %arg0, %c0_i32 : i32, i32
  }
  func.func @transform_1(%arg0: i32) -> (i32, i32) {
    %c0_i32 = arith.constant 0 : i32
    %c0_i32_0 = arith.constant 0 : i32
    %c0_i32_1 = arith.constant 0 : i32
    return %c0_i32, %c0_i32_0 : i32, i32
  }
  func.func @transform_2(%arg0: i32) -> (i32, i32) {
    %c0_i32 = arith.constant 0 : i32
    %c0_i32_0 = arith.constant 0 : i32
    %c0_i32_1 = arith.constant 0 : i32
    return %c0_i32, %c0_i32_0 : i32, i32
  }
  func.func @transform_3(%arg0: i32) -> (i32, i32) {
    %c0_i32 = arith.constant 0 : i32
    %c0_i32_0 = arith.constant 0 : i32
    %c0_i32_1 = arith.constant 0 : i32
    return %c0_i32, %c0_i32_0 : i32, i32
  }
  func.func @transform_4(%arg0: i32) -> (i32, i32) {
    %c0_i32 = arith.constant 0 : i32
    %c0_i32_0 = arith.constant 0 : i32
    %c0_i32_1 = arith.constant 0 : i32
    return %c0_i32, %c0_i32_0 : i32, i32
  }
  func.func @transform_5(%arg0: i32) -> (i32, i32, i32) {
    %c0_i32 = arith.constant 0 : i32
    %c0_i32_0 = arith.constant 0 : i32
    %c0_i32_1 = arith.constant 0 : i32
    %c0_i32_2 = arith.constant 0 : i32
    return %c0_i32, %c0_i32_0, %c0_i32_1 : i32, i32, i32
  }
  func.func @transform_6(%arg0: i32) -> (i32, i32, i32) {
    %c0_i32 = arith.constant 0 : i32
    %c0_i32_0 = arith.constant 0 : i32
    %c0_i32_1 = arith.constant 0 : i32
    %c0_i32_2 = arith.constant 0 : i32
    return %c0_i32, %c0_i32_0, %c0_i32_1 : i32, i32, i32
  }
  func.func @transform_7(%arg0: i32) -> (i32, i32) {
    %c0_i32 = arith.constant 0 : i32
    %c0_i32_0 = arith.constant 0 : i32
    %c0_i32_1 = arith.constant 0 : i32
    return %c0_i32, %c0_i32_0 : i32, i32
  }
  func.func @transform_8(%arg0: i32) -> (i32, i32) {
    %c0_i32 = arith.constant 0 : i32
    %c0_i32_0 = arith.constant 0 : i32
    %c0_i32_1 = arith.constant 0 : i32
    return %c0_i32, %c0_i32_0 : i32, i32
  }
  func.func @transform_9(%arg0: i32) -> (i32, i32) {
    %c0_i32 = arith.constant 0 : i32
    %c0_i32_0 = arith.constant 0 : i32
    %c0_i32_1 = arith.constant 0 : i32
    return %c0_i32, %c0_i32_0 : i32, i32
  }
  func.func @transform_10(%arg0: i32) -> (i32, i32) {
    %c0_i32 = arith.constant 0 : i32
    %c0_i32_0 = arith.constant 0 : i32
    %c0_i32_1 = arith.constant 0 : i32
    return %c0_i32, %c0_i32_0 : i32, i32
  }
  func.func @transform_11(%arg0: i32) -> (i32, i32) {
    %c0_i32 = arith.constant 0 : i32
    %c0_i32_0 = arith.constant 0 : i32
    %c0_i32_1 = arith.constant 0 : i32
    return %c0_i32, %c0_i32_0 : i32, i32
  }
  func.func @transform_12(%arg0: i32) -> (i32, i32) {
    %c0_i32 = arith.constant 0 : i32
    %c0_i32_0 = arith.constant 0 : i32
    %c0_i32_1 = arith.constant 0 : i32
    return %c0_i32, %c0_i32_0 : i32, i32
  }
  func.func @transform_13(%arg0: i32) -> (i32, i32) {
    %c0_i32 = arith.constant 0 : i32
    %c0_i32_0 = arith.constant 0 : i32
    %c0_i32_1 = arith.constant 0 : i32
    return %c0_i32, %c0_i32_0 : i32, i32
  }
  func.func @transform_14(%arg0: i32) -> (i32, i32) {
    %c0_i32 = arith.constant 0 : i32
    %c0_i32_0 = arith.constant 0 : i32
    %c0_i32_1 = arith.constant 0 : i32
    return %c0_i32, %c0_i32_0 : i32, i32
  }
  func.func @transform_15(%arg0: i32) -> (i32, i32) {
    %c0_i32 = arith.constant 0 : i32
    %c0_i32_0 = arith.constant 0 : i32
    return %arg0, %c0_i32 : i32, i32
  }
  func.func @transform_16(%arg0: i32) -> (i32, i32) {
    %c0_i32 = arith.constant 0 : i32
    %c0_i32_0 = arith.constant 0 : i32
    return %arg0, %c0_i32 : i32, i32
  }
  func.func @transform_17(%arg0: i32) -> (i32, i32) {
    %c0_i32 = arith.constant 0 : i32
    %c0_i32_0 = arith.constant 0 : i32
    return %arg0, %c0_i32 : i32, i32
  }
  func.func @transform_18(%arg0: i32) -> (i32, i32) {
    %c0_i32 = arith.constant 0 : i32
    %c0_i32_0 = arith.constant 0 : i32
    return %arg0, %c0_i32 : i32, i32
  }
  func.func @transform_19(%arg0: i32) -> (i32, i32) {
    %c0_i32 = arith.constant 0 : i32
    %c0_i32_0 = arith.constant 0 : i32
    return %arg0, %c0_i32 : i32, i32
  }
}

</mosaic_0001>

<bundles_post_ra>
// kernel: tpu_custom_call.1
= control target key start
LH: loop header
LB: loop body
LE: loop exit
PB: predicated region body
PF: predicated region fallthrough
CT: control target
= control target key end

     0   :  { %s1579_s0 = inlined_call_operand.vmem [shape: f32[8,16], index: 0, kind: input, shape index: {}]   ;;  %s1580_s1 = inlined_call_operand.vmem [shape: f32[16,32], index: 1, kind: input, shape index: {}]   ;;  %s1581_s2 = inlined_call_operand.vmem [shape: f32[1,32], index: 2, kind: input, shape index: {}]   ;;  %s1582_s3 = inlined_call_operand.vmem [shape: f32[32,8], index: 3, kind: input, shape index: {}]   ;;  %s1583_s4 = inlined_call_operand.vmem [shape: f32[1,8], index: 4, kind: input, shape index: {}]   ;;  %s1584_s5 = inlined_call_operand.vmem [shape: f32[2,16,8], index: 5, kind: input, shape index: {}]   ;;  %s1585_s6 = inlined_call_operand.vmem [shape: f32[2,1,16], index: 6, kind: input, shape index: {}]   ;;  %s1586_s7 = inlined_call_operand.vmem [shape: f32[8,32], index: 7, kind: input, shape index: {}]   ;;  %s1587_s8 = inlined_call_operand.vmem [shape: f32[1,32], index: 8, kind: input, shape index: {}]   ;;  %s1588_s9 = inlined_call_operand.vmem [shape: f32[32,16], index: 9, kind: input, shape index: {}]   ;;  %s1589_s10 = inlined_call_operand.vmem [shape: f32[1,16], index: 10, kind: input, shape index: {}]   ;;  %s1590_s11 = inlined_call_operand.vmem [shape: f32[8,32], index: 11, kind: input, shape index: {}]   ;;  %s1591_s12 = inlined_call_operand.vmem [shape: f32[1,32], index: 12, kind: input, shape index: {}]   ;;  %s1592_s13 = inlined_call_operand.vmem [shape: f32[32,16], index: 13, kind: input, shape index: {}]   ;;  %s1593_s14 = inlined_call_operand.vmem [shape: f32[1,16], index: 14, kind: input, shape index: {}]   ;;  %s1594_s15 = inlined_call_operand.hbm [shape: f32[8,8], index: 15, kind: output, shape index: {0}]   ;;  %s1595_s16 = inlined_call_operand.hbm [shape: f32[8,16], index: 16, kind: output, shape index: {1}]   ;;  %s1596_s17 = inlined_call_operand.hbm [shape: f32[8,16], index: 17, kind: output, shape index: {2}]   ;;  %s1597_s18 = inlined_call_operand.vmem [shape: s32[8,2], index: 18, kind: output, shape index: {3}]   ;;  %s1598_s19 = inlined_call_operand.hbm [shape: f32[8,128], index: 19, kind: output, shape index: {4}]  }
   0x1   :  { %1601 = sst [smem:[#allocation12_spill]] %s1579_s0 }
   0x2   :  { %1602 = sst [smem:[#allocation13_spill]] %s1580_s1 }
   0x3   :  { %1603 = sst [smem:[#allocation14_spill]] %s1581_s2 }
   0x4   :  { %1604 = sst [smem:[#allocation15_spill]] %s1582_s3 }
   0x5   :  { %25 = vsyncpa [#allocation3], 0 }
   0x6   :  { %26 = vsyncpa [#allocation5], 0  ;;  %s1605_s20 = sld [smem:[#allocation13_spill]]  ;;  %v1288_v1 = vmov 0.0   ;;  %vm1289_vm0 = vmmov 0  }
   0x7   :  { %1112 = vmatprep.subr.mxu0 %v1288_v1  ;;  %1116 = vmatprep.mubr.msk.f32.mxu0 %vm1289_vm0, %v1288_v1  ;;  %s1606_s23 = sld [smem:[#allocation15_spill]] }
   0xc   :  { %v60_v0 = vld [vmem:[%s1605_s20 + $0x8] sm:$0xff]  ;;  %v59_v2 = vld [vmem:[%s1605_s20] sm:$0xff] }
   0xd   :  { %v146_v3 = vld [vmem:[%s1606_s23 + $0x18] sm:$0xff] }
   0xe   :  { %27 = vsyncpa [#allocation8], 0  ;;  %1113 = vmatpush3.msra.mxu0 %v60_v0  ;;  %s1607_s3 = sld [smem:[#allocation12_spill]]  ;;  %vm68_vm1 = vcmask 130048   ;;  %1119 = vmatprep.subr.mxu1 %v1288_v1  ;;  %v145_v5 = vld [vmem:[%s1606_s23 + $0x10] sm:$0xff]  ;;  %v144_v6 = vld [vmem:[%s1606_s23 + $0x8] sm:$0xff]  ;;  %v230_v25 = vlaneseq }
   0xf   :  { %1114 = vmatprep.subr.mxu0 %v1288_v1  ;;  %1120 = vmatpush3.msra.mxu1 %v146_v3  ;;  %v143_v7 = vld [vmem:[%s1606_s23] sm:$0xff]  ;;  %vm228_vm2 = vcmask 64512   ;;  %v233_v8 = vld [vmem:[%s1584_s5 + $0x8] sm:$0xff]  ;;  %s1608_s2 = sld [smem:[#allocation14_spill]]  ;;  %vm154_vm3 = vcmask 261120   ;;  %v1062_v36 = vld [vmem:[%s1584_s5 + $0x18] sm:$0xff] }
  0x10   :  { %1115 = vmatpush3.msra.mxu0 %v59_v2  ;;  %1121 = vmatprep.subr.mxu1 %v1288_v1  ;;  %v232_v14 = vld [vmem:[%s1584_s5] sm:$0xff]  ;;  %v1462_v26 = vand.u32 127, %v230_v25  ;;  %v1061_v43 = vld [vmem:[%s1584_s5 + $0x10] sm:$0xff]  ;;  %vm633_vm9 = vcmask 7168   ;;  %vm635_vm10 = vcmask 15360   ;;  %v722_v25 = vld [vmem:[%s1588_s9 + $0x18] sm:$0xff] }
  0x11   :  { %1127 = vmatprep.mubr.msk.f32.mxu1 %vm1289_vm0, %v1288_v1  ;;  %1130 = vmatprep.subr.mxu0 %v1288_v1  ;;  %v1053_v15 = vld [vmem:[%s1583_s4] ss:$0 sm:$0xff]  ;;  %v1067_v48 = vld [vmem:[%s1585_s6 + $0x1] ss:$0 sm:$0xff] }
  0x12   :  { %1122 = vmatpush3.msra.mxu1 %v145_v5  ;;  %v1058_v20 = vld [vmem:[%s1585_s6] ss:$0 sm:$0xff] }
  0x13   :  { %1123 = vmatprep.subr.mxu1 %v1288_v1 }
  0x14   :  { %v1409_v4 = vld [vmem:[%s1607_s3] sm:$0xff]  ;;  %1124 = vmatpush3.msra.mxu1 %v144_v6 }
  0x15   :  { %1117 = vmatmul.mubr.msk.f32.vlgmr.msra.gmra.mxu0 %vm68_vm1, %v1409_v4  ;;  %1125 = vmatprep.subr.mxu1 %v1288_v1  ;;  %v1051_v9 = vld [vmem:[%s1608_s2] ss:$0 sm:$0xff] }
  0x16   :  { %1134 = vmatprep.mubr.msk.f32.mxu0 %vm1289_vm0, %v1288_v1  ;;  %1126 = vmatpush3.msra.mxu1 %v143_v7 }
  0x17   :  { %1137 = vmatprep.subr.mxu1 %v1288_v1  ;;  %1131 = vmatpush3.xpose.msk.msra.mxu0 %vm228_vm2, %v233_v8 }
  0x18   :  { %1132 = vmatprep.subr.mxu0 %v1288_v1 }
  0x1b   :  { %1133 = vmatpush3.xpose.msk.msra.mxu0 %vm228_vm2, %v232_v14 }
  0x1c   :  { %1144 = vmatprep.subr.mxu0 %v1288_v1 }
  0xd5   :  { %v138_v10 = vpop.f32.mrf.mxu0 }
  0xd6   :  { %v139_v11 = vadd.f32 %v1051_v9, %v138_v10 }
  0xd7   :  { %v1118_v12 = vpop.f32.mrf.mxu0 }
  0xd8   :  { %v142_v13 = vmax.f32 %v139_v11, 0.0 }
  0xda   :  { %1128 = vmatmul.mubr.msk.f32.vlgmr.msra.gmra.mxu1 %vm154_vm3, %v142_v13 }
  0xdb   :  { %1138 = vmatpush3.msra.mxu1 %v233_v8  ;;  %1141 = vmatprep.mubr.msk.f32.mxu1 %vm1289_vm0, %v1288_v1 }
  0xdc   :  { %1139 = vmatprep.subr.mxu1 %v1288_v1 }
  0xdd   :  { %1140 = vmatpush3.msra.mxu1 %v232_v14 }
  0xde   :  { %1151 = vmatprep.subr.mxu1 %v1288_v1 }
 0x19a   :  { %v224_v16 = vpop.f32.mrf.mxu1 }
 0x19b   :  { %v225_v17 = vadd.f32 %v1053_v15, %v224_v16  ;;  %v637_v16 = vld [vmem:[%s1586_s7] sm:$0xff]  ;;  %s1291_s7 = smov [#allocation2]  }
 0x19c   :  { %v1129_v18 = vpop.f32.mrf.mxu1 }
 0x19d   :  { %229 = vst.msk [vmem:[#allocation2] sm:$0xff] %vm228_vm2, %v225_v17  ;;  %1135 = vmatmul.mubr.msk.f32.vlgmr.msra.gmra.mxu0 %vm228_vm2, %v225_v17 }
 0x19e   :  { %1148 = vmatprep.mubr.msk.f32.mxu0 %vm1289_vm0, %v1288_v1  ;;  %1145 = vmatpush3.xpose.msk.msra.mxu0 %vm228_vm2, %v1062_v36 }
 0x19f   :  { %1146 = vmatprep.subr.mxu0 %v1288_v1 }
 0x1a2   :  { %1147 = vmatpush3.xpose.msk.msra.mxu0 %vm228_vm2, %v1061_v43 }
 0x1a3   :  { %1163 = vmatprep.subr.mxu0 %v1288_v1 }
 0x25d   :  { %v310_v19 = vpop.f32.mrf.mxu0 }
 0x25e   :  { %v314_v21 = vmul.f32 2.0, %v310_v19 }
 0x25f   :  { %v1136_v22 = vpop.f32.mrf.mxu0 }
 0x260   :  { %v321_v23 = vsub.f32 %v1058_v20, %v314_v21  ;;  %v816_v21 = vld [vmem:[%s1590_s11] sm:$0xff]  ;;  %s998_s11 = sshll.u32 %s1291_s7, 4  ;;  %s999_s11 = int_to_ptr.vmem [resolvable:$true] %s998_s11 }
 0x262   :  { %v322_v24 = vsel %vm68_vm1, %v321_v23, inf }
 0x263   :  { %323 = vmin.xlane.f32.xlu0 %v322_v24 }
 0x2ec   :  { %v324_v27 = vpop.xlane.xlu0 %323 }
 0x2ed   :  { %vm325_vm4 = vcmp.le.f32.partialorder %v321_v23, %v324_v27  ;;  %v721_v27 = vld [vmem:[%s1588_s9 + $0x10] sm:$0xff] }
 0x2ee   :  { %v326_v28 = vsel %vm325_vm4, %v1462_v26, 16 }
 0x2ef   :  { %v327_v29 = vsel %vm68_vm1, %v326_v28, 2147483647  ;;  %v720_v28 = vld [vmem:[%s1588_s9 + $0x8] sm:$0xff] }
 0x2f0   :  { %v329_v30 = vshra.s32 %v327_v29, 16  ;;  %v328_v32 = vand.u32 65535, %v327_v29  ;;  %v898_v29 = vld [vmem:[%s1592_s13 + $0x18] sm:$0xff] }
 0x2f2   :  { %v331_v31 = vcvt.s32.f32 %v329_v30  ;;  %v330_v34 = vcvt.s32.f32 %v328_v32  ;;  %v719_v30 = vld [vmem:[%s1588_s9] sm:$0xff]  ;;  %v896_v32 = vld [vmem:[%s1592_s13 + $0x8] sm:$0xff] }
 0x2f4   :  { %332 = vmin.xlane.f32.xlu0 %v331_v31 }
 0x37d   :  { %v333_v33 = vpop.xlane.xlu0 %332 }
 0x37e   :  { %vm334_vm5 = vcmp.eq.f32.partialorder %v331_v31, %v333_v33  ;;  %v339_v37 = vcvt.f32.s32 %v333_v33  ;;  %v897_v31 = vld [vmem:[%s1592_s13 + $0x10] sm:$0xff]  ;;  %v895_v33 = vld [vmem:[%s1592_s13] sm:$0xff] }
 0x37f   :  { %v335_v35 = vsel %vm334_vm5, %v330_v34, inf }
 0x380   :  { %336 = vmin.xlane.f32.xlu1 %v335_v35  ;;  %v340_v39 = vshll.u32 %v339_v37, 16 }
 0x409   :  { %v337_v38 = vpop.xlane.xlu1 %336 }
 0x40a   :  { %v338_v40 = vcvt.f32.s32 %v337_v38 }
 0x40c   :  { %v341_v41 = vadd.s32 %v340_v39, %v338_v40 }
 0x40e   :  { %vm342_vm6 = vcmp.eq.s32.totalorder %v1462_v26, %v341_v41 }
 0x40f   :  { %v1059_v42 = vsel %vm342_vm6, 1.0, %v1288_v1 }
 0x410   :  { %1142 = vmatmul.mubr.msk.f32.vlgmr.msra.gmra.mxu1 %vm68_vm1, %v1059_v42 }
 0x411   :  { %1152 = vmatpush3.msra.mxu1 %v1062_v36  ;;  %1155 = vmatprep.mubr.msk.f32.mxu1 %vm1289_vm0, %v1288_v1 }
 0x412   :  { %1153 = vmatprep.subr.mxu1 %v1288_v1 }
 0x413   :  { %1154 = vmatpush3.msra.mxu1 %v1061_v43 }
 0x414   :  { %1158 = vmatprep.subr.mxu1 %v1288_v1 }
 0x4d0   :  { %v414_v44 = vpop.f32.mrf.mxu1 }
 0x4d1   :  { %v431_v45 = vsub.f32 %v225_v17, %v414_v44  ;;  %v418_v56 = vsub.f32 %v414_v44, %v225_v17 }
 0x4d2   :  { %v1143_v46 = vpop.f32.mrf.mxu1 }
 0x4d3   :  { %1149 = vmatmul.mubr.msk.f32.vlgmr.msra.gmra.mxu0 %vm228_vm2, %v431_v45  ;;  %v419_v59 = vmul.f32 %v418_v56, %v418_v56 }
 0x4d4   :  { %1171 = vmatprep.mubr.msk.f32.mxu0 %vm1289_vm0, %v1288_v1  ;;  %1164 = vmatpush3.msra.mxu0 %v722_v25 }
 0x4d5   :  { %v420_v60 = vsel %vm228_vm2, %v419_v59, 0.0  ;;  %1165 = vmatprep.subr.mxu0 %v1288_v1 }
 0x4d6   :  { %1166 = vmatpush3.msra.mxu0 %v721_v27 }
 0x4d7   :  { %1167 = vmatprep.subr.mxu0 %v1288_v1 }
 0x4d8   :  { %1168 = vmatpush3.msra.mxu0 %v720_v28 }
 0x4d9   :  { %1169 = vmatprep.subr.mxu0 %v1288_v1 }
 0x4da   :  { %1170 = vmatpush3.msra.mxu0 %v719_v30 }
 0x593   :  { %v512_v47 = vpop.f32.mrf.mxu0 }
 0x594   :  { %v516_v49 = vmul.f32 2.0, %v512_v47 }
 0x595   :  { %v1150_v50 = vpop.f32.mrf.mxu0 }
 0x596   :  { %v523_v51 = vsub.f32 %v1067_v48, %v516_v49  ;;  %v1072_v50 = vld [vmem:[%s1589_s10] ss:$0 sm:$0xff]  ;;  %s1290_s10 = smov [#allocation4]  }
 0x598   :  { %v524_v52 = vsel %vm68_vm1, %v523_v51, inf }
 0x599   :  { %525 = vmin.xlane.f32.xlu1 %v524_v52 }
 0x622   :  { %v526_v53 = vpop.xlane.xlu1 %525 }
 0x623   :  { %vm527_vm7 = vcmp.le.f32.partialorder %v523_v51, %v526_v53 }
 0x624   :  { %v528_v54 = vsel %vm527_vm7, %v1462_v26, 16 }
 0x625   :  { %v529_v55 = vsel %vm68_vm1, %v528_v54, 2147483647  ;;  %v1076_v54 = vld [vmem:[%s1593_s14] ss:$0 sm:$0xff] }
 0x626   :  { %v531_v57 = vshra.s32 %v529_v55, 16  ;;  %v530_v61 = vand.u32 65535, %v529_v55 }
 0x628   :  { %v533_v58 = vcvt.s32.f32 %v531_v57  ;;  %v532_v63 = vcvt.s32.f32 %v530_v61 }
 0x62a   :  { %534 = vmin.xlane.f32.xlu0 %v533_v58 }
 0x62e   :  { %421 = vadd.xlane.f32.xlu0 %v420_v60 }
 0x6b3   :  { %v535_v62 = vpop.xlane.xlu0 %534 }
 0x6b4   :  { %vm536_vm8 = vcmp.eq.f32.partialorder %v533_v58, %v535_v62  ;;  %v541_v10 = vcvt.f32.s32 %v535_v62 }
 0x6b5   :  { %v537_v0 = vsel %vm536_vm8, %v532_v63, inf }
 0x6b6   :  { %538 = vmin.xlane.f32.xlu1 %v537_v0  ;;  %v542_v12 = vshll.u32 %v541_v10, 16 }
 0x6b7   :  { %v422_v2 = vpop.xlane.xlu0 %421 }
 0x6b8   :  { %v423_v3 = vrot.slane %v422_v2, 4 }
 0x6ba   :  { %v424_v5 = vadd.f32 %v423_v3, %v422_v2 }
 0x6bc   :  { %v425_v6 = vrot.slane %v424_v5, 2 }
 0x6be   :  { %v426_v7 = vadd.f32 %v425_v6, %v424_v5 }
 0x6c0   :  { %v427_v8 = vrot.slane %v426_v7, 1 }
 0x6c2   :  { %v428_v9 = vadd.f32 %v427_v8, %v426_v7 }
 0x6c4   :  { %1190 = vpush %v428_v9 }
 0x73f   :  { %v539_v11 = vpop.xlane.xlu1 %538 }
 0x740   :  { %v540_v13 = vcvt.f32.s32 %v539_v11 }
 0x742   :  { %v543_v14 = vadd.s32 %v542_v12, %v540_v13 }
 0x744   :  { %vm544_vm11 = vcmp.eq.s32.totalorder %v1462_v26, %v543_v14  ;;  %v634_v15 = vsel %vm633_vm9, %v341_v41, %v543_v14  ;;  %v1070_v41 = vld [vmem:[%s1587_s8] ss:$0 sm:$0xff] }
 0x745   :  { %v1068_v17 = vsel %vm544_vm11, 1.0, %v1288_v1  ;;  %636 = vst.msk [vmem:[%s1597_s18] sm:$0xff] %vm635_vm10, %v634_v15 }
 0x746   :  { %1156 = vmatmul.mubr.msk.f32.vlgmr.msra.gmra.mxu1 %vm68_vm1, %v1068_v17 }
 0x747   :  { %1159 = vmatpush3.msra.mxu1 %v637_v16  ;;  %1160 = vmatprep.mubr.msk.f32.mxu1 %vm1289_vm0, %v1288_v1 }
 0x748   :  { %1174 = vmatprep.subr.mxu1 %v1288_v1 }
 0x806   :  { %v616_v18 = vpop.f32.mrf.mxu1 }
 0x807   :  { %v620_v19 = vsub.f32 %v616_v18, %v431_v45  ;;  %v632_v20 = vadd.f32 %v616_v18, %v414_v44  ;;  %v1074_v44 = vld [vmem:[%s1591_s12] ss:$0 sm:$0xff]  ;;  %s1008_s12 = sshll.u32 %s1290_s10, 4  ;;  %s1009_s12 = int_to_ptr.vmem [resolvable:$true] %s1008_s12 }
 0x808   :  { %v1157_v22 = vpop.f32.mrf.mxu1  ;;  %s1202_s14 = scalar_lea.vmem %s1009_s12, 128  ;;  %p1207_p1 = scmp.lt.s32.totalorder %s1009_s12, %s1009_s12 }
 0x809   :  { %v621_v23 = vmul.f32 %v620_v19, %v620_v19  ;;  %1161 = vmatmul.mubr.msk.f32.vlgmr.msra.gmra.mxu1 %vm228_vm2, %v632_v20  ;;  %p1203_p0 = scmp.ne.s32.totalorder %s1009_s12, %s1202_s14  ;;  %p1208_p2 = scmp.lt.s32.totalorder %s1202_s14, %s1202_s14 }
 0x80a   :  { %1175 = vmatpush3.msra.mxu1 %v816_v21  ;;  %1176 = vmatprep.mubr.msk.f32.mxu1 %vm1289_vm0, %v1288_v1 }
 0x80b   :  { %v622_v24 = vsel %vm228_vm2, %v621_v23, 0.0  ;;  %1179 = vmatprep.subr.mxu1 %v1288_v1  ;;  %p1209_p3 = por %p1208_p2, %p1207_p1 }
 0x80c   :  { %623 = vadd.xlane.f32.xlu1 %v622_v24 }
 0x80d   :  { %1177 = vmatmul.mubr.msk.f32.vlgmr.msra.gmra.mxu1 %vm228_vm2, %v632_v20  ;;  %p1210_p4 = pnand %p1209_p3, %p1203_p0 }
 0x80e   :  { %1187 = vmatprep.mubr.msk.f32.mxu1 %vm1289_vm0, %v1288_v1  ;;  %1180 = vmatpush3.msra.mxu1 %v898_v29 }
 0x80f   :  { %1181 = vmatprep.subr.mxu1 %v1288_v1 }
 0x810   :  { %1182 = vmatpush3.msra.mxu1 %v897_v31 }
 0x811   :  { %1183 = vmatprep.subr.mxu1 %v1288_v1 }
 0x812   :  { %1184 = vmatpush3.msra.mxu1 %v896_v32 }
 0x813   :  { %1185 = vmatprep.subr.mxu1 %v1288_v1 }
 0x814   :  { %1186 = vmatpush3.msra.mxu1 %v895_v33 }
 0x895   :  { %v624_v34 = vpop.xlane.xlu1 %623 }
 0x896   :  { %v625_v35 = vrot.slane %v624_v34, 4 }
 0x898   :  { %v626_v36 = vadd.f32 %v625_v35, %v624_v34 }
 0x89a   :  { %v627_v37 = vrot.slane %v626_v36, 2 }
 0x89c   :  { %v628_v38 = vadd.f32 %v627_v37, %v626_v36 }
 0x89e   :  { %v629_v39 = vrot.slane %v628_v38, 1 }
 0x8a0   :  { %v630_v40 = vadd.f32 %v629_v39, %v628_v38 }
 0x8a2   :  { %1192 = vpush %v630_v40 }
 0x8c9   :  { %v714_v42 = vpop.f32.mrf.mxu1 }
 0x8ca   :  { %v715_v43 = vadd.f32 %v1070_v41, %v714_v42 }
 0x8cb   :  { %v1162_v1 = vpop.f32.mrf.mxu1 }
 0x8cc   :  { %v718_v45 = vmax.f32 %v715_v43, 0.0 }
 0x8cd   :  { %v890_v46 = vpop.f32.mrf.mxu1 }
 0x8ce   :  { %v891_v47 = vadd.f32 %v1074_v44, %v890_v46  ;;  %1172 = vmatmul.mubr.msk.f32.vlgmr.msra.gmra.mxu0 %vm154_vm3, %v718_v45 }
 0x8cf   :  { %v1178_v48 = vpop.f32.mrf.mxu1 }
 0x8d0   :  { %v894_v49 = vmax.f32 %v891_v47, 0.0 }
 0x8d2   :  { %1188 = vmatmul.mubr.msk.f32.vlgmr.msra.gmra.mxu1 %vm154_vm3, %v894_v49 }
 0x98e   :  { %v799_v51 = vpop.f32.mrf.mxu0 }
 0x98f   :  { %v800_v52 = vadd.f32 %v1072_v50, %v799_v51 }
 0x990   :  { %v1173_v53 = vpop.f32.mrf.mxu0 }
 0x991   :  { %v804_v55 = vsub.f32 %v800_v52, %v1409_v4  ;;  %803 = vst.msk [vmem:[#allocation4] sm:$0xff] %vm68_vm1, %v800_v52 }
 0x992   :  { %v975_v56 = vpop.f32.mrf.mxu1 }
 0x993   :  { %v976_v57 = vadd.f32 %v1076_v54, %v975_v56  ;;  %v805_v58 = vmul.f32 %v804_v55, %v804_v55 }
 0x994   :  { %v1189_v59 = vpop.f32.mrf.mxu1 }
 0x995   :  { %979 = vst.msk [vmem:[#allocation6] sm:$0xff] %vm68_vm1, %v976_v57  ;;  %v806_v60 = vsel %vm68_vm1, %v805_v58, 0.0 }
 0x996   :  { %807 = vadd.xlane.f32.xlu0 %v806_v60 }
 0x997   :  { %1213 = shalt.err (!%p1210_p4)
}
 0x998   :  { %1011 = dma.vmem_to_hbm [thread:$0]  %s1009_s12, 128, %s1595_s16, [#allocation5]  }
 0x999   :  { %s1222_s24 = scalar_lea.vmem %s999_s11, 128  ;;  %p1227_p6 = scmp.lt.s32.totalorder %s999_s11, %s999_s11 }
 0x99a   :  { %p1223_p5 = scmp.ne.s32.totalorder %s999_s11, %s1222_s24  ;;  %p1228_p7 = scmp.lt.s32.totalorder %s1222_s24, %s1222_s24 }
 0x99c   :  { %p1229_p8 = por %p1228_p7, %p1227_p6 }
 0x99e   :  { %p1230_p9 = pnand %p1229_p8, %p1223_p5 }
 0x9a0   :  { %1233 = shalt.err (!%p1230_p9)
}
 0x9a1   :  { %1001 = dma.vmem_to_hbm [thread:$0]  %s999_s11, 128, %s1594_s15, [#allocation3]  }
 0x9a2   :  { %s1292_s26 = smov [#allocation6]  }
 0x9a3   :  { %s1018_s27 = sshll.u32 %s1292_s26, 4  ;;  %s1019_s27 = int_to_ptr.vmem [resolvable:$true] %s1018_s27 }
 0x9a4   :  { %s1242_s4 = scalar_lea.vmem %s1019_s27, 128  ;;  %p1247_p11 = scmp.lt.s32.totalorder %s1019_s27, %s1019_s27 }
 0x9a5   :  { %p1243_p10 = scmp.ne.s32.totalorder %s1019_s27, %s1242_s4  ;;  %p1248_p12 = scmp.lt.s32.totalorder %s1242_s4, %s1242_s4 }
 0x9a7   :  { %p1249_p13 = por %p1248_p12, %p1247_p11 }
 0x9a9   :  { %p1250_p0 = pnand %p1249_p13, %p1243_p10 }
 0x9ab   :  { %1253 = shalt.err (!%p1250_p0)
}
 0x9ac   :  { %1021 = dma.vmem_to_hbm [thread:$0]  %s1019_s27, 128, %s1596_s17, [#allocation5]   ;;  %vm983_vm12 = vcmp.eq.s32.totalorder %v1462_v26, 1  ;;  %vm980_vm13 = vcmp.eq.s32.totalorder %v1462_v26, 0  ;;  %vm987_vm14 = vcmp.eq.s32.totalorder %v1462_v26, 2 }
 0x9ad   :  { %s1191_s15 = spop %1190  ;;  %s1293_s17 = smov [#allocation7]  }
 0x9ae   :  { %s1193_s29 = spop %1192  ;;  %v984_v5 = vstv %s1191_s15  ;;  %s1030_s30 = sshll.u32 %s1293_s17, 4  ;;  %s1031_s30 = int_to_ptr.vmem [resolvable:$true] %s1030_s30 }
 0x9af   :  { %v988_v6 = vstv %s1193_s29  ;;  %v985_v8 = vsel %vm983_vm12, %v984_v5, 0.0  ;;  %s1262_s20 = scalar_lea.vmem %s1031_s30, 128  ;;  %p1267_p2 = scmp.lt.s32.totalorder %s1031_s30, %s1031_s30 }
 0x9b0   :  { %v989_v11 = vsel %vm987_vm14, %v988_v6, 0.0  ;;  %p1263_p1 = scmp.ne.s32.totalorder %s1031_s30, %s1262_s20  ;;  %p1268_p3 = scmp.lt.s32.totalorder %s1262_s20, %s1262_s20 }
 0x9b2   :  { %p1269_p4 = por %p1268_p3, %p1267_p2 }
 0x9b4   :  { %p1270_p5 = pnand %p1269_p4, %p1263_p1 }
 0xa1f   :  { %v808_v4 = vpop.xlane.xlu0 %807 }
 0xa20   :  { %v809_v61 = vrot.slane %v808_v4, 4 }
 0xa22   :  { %v810_v62 = vadd.f32 %v809_v61, %v808_v4 }
 0xa24   :  { %v811_v63 = vrot.slane %v810_v62, 2 }
 0xa26   :  { %v812_v0 = vadd.f32 %v811_v63, %v810_v62 }
 0xa28   :  { %v813_v2 = vrot.slane %v812_v0, 1 }
 0xa2a   :  { %v814_v3 = vadd.f32 %v813_v2, %v812_v0 }
 0xa2c   :  { %1194 = vpush %v814_v3 }
 0xa5d   :  { %s1195_s0 = spop %1194 }
 0xa5e   :  { %v981_v7 = vstv %s1195_s0 }
 0xa5f   :  { %v982_v9 = vsel %vm980_vm13, %v981_v7, 0.0 }
 0xa60   :  { %v986_v10 = vadd.f32 %v985_v8, %v982_v9 }
 0xa62   :  { %v990_v12 = vadd.f32 %v989_v11, %v986_v10 }
 0xa64   :  { %991 = vst [vmem:[#allocation7] sm:$0xff] %v990_v12 }
 0xa65   :  { %1273 = shalt.err (!%p1270_p5)
}
 0xa66   :  { %1033 = dma.vmem_to_hbm [thread:$0]  %s1031_s30, 128, %s1598_s19, [#allocation8]  }
 0xa67   :  { %1282 = dma.done.wait [#allocation3], 128  }
 0xa68   :  { %1283 = vsyncadd [#allocation3], 4294967168 }
 0xa69   :  { %1284 = dma.done.wait [#allocation5], 256  }
 0xa6a   :  { %1285 = vsyncadd [#allocation5], 4294967040 }
 0xa6b   :  { %1286 = dma.done.wait [#allocation8], 128  }
 0xa6c   :  { %1287 = vsyncadd [#allocation8], 4294967168 }
 0xa6d   :  { %1048 = vsyncpa [#allocation3], 1 }
 0xa6e   :  { %1049 = vsyncpa [#allocation5], 1 }
 0xa6f   :  { %1050 = vsyncpa [#allocation8], 1 }

</bundles_post_ra>
